<compile_context>
chip_gen: v7x
topology: tpu7x:2x2x1
jax: 0.10.0
libtpu: 0.0.40
codegen_flags: <defaults>
</compile_context>

<pallas_src>
import functools

import jax
import jax.numpy as jnp
from jax.experimental import pallas as pl
from jax.experimental.pallas import tpu as pltpu

_LANE = 128


def _round_up(x, m):
    return ((x + m - 1) // m) * m


def _tile_sum(x):
    """(bn, Lb) -> (1, 1): sublane reduce then lane reduce."""
    return jnp.sum(jnp.sum(x, axis=0, keepdims=True), axis=1, keepdims=True)


def _gdl_kernel(x0_ref, x1_ref, t_ref, out_ref,
                acc_p1_ref, acc_i1_ref, acc_t1_ref,
                *, nl, epsilon, pad_count):
    """Per-tile partial sums + final scalar combine.

    x0_ref, x1_ref : (bn, Lb) logits for class 0 / class 1 (views into pred)
    t_ref          : (bn, Lb) integer labels in {0, 1} (0 in padding)
    out_ref        : (1, 1) float32 loss (written at the last grid step)
    acc_*_ref      : (1, 1) float32 running sums (VMEM scratch)
    """
    i = pl.program_id(0)
    j = pl.program_id(1)
    is_first = jnp.logical_and(i == 0, j == 0)
    is_last = jnp.logical_and(i == pl.num_programs(0) - 1,
                              j == pl.num_programs(1) - 1)

    @pl.when(is_first)
    def _init():
        acc_p1_ref[...] = jnp.zeros_like(acc_p1_ref)
        acc_i1_ref[...] = jnp.zeros_like(acc_i1_ref)
        acc_t1_ref[...] = jnp.zeros_like(acc_t1_ref)

    x0 = x0_ref[...].astype(jnp.float32)
    x1 = x1_ref[...].astype(jnp.float32)
    t1 = t_ref[...].astype(jnp.float32)       # labels already in {0, 1}

    # softmax over 2 classes == sigmoid(x1 - x0). Tanh form keeps the
    # transcendental on the EUP slot (one tanh + FMA, no VALU divide).
    d = x1 - x0
    p1 = 0.5 * jnp.tanh(0.5 * d) + 0.5

    acc_p1_ref[...] += _tile_sum(p1)
    acc_i1_ref[...] += _tile_sum(p1 * t1)
    acc_t1_ref[...] += _tile_sum(t1)

    @pl.when(is_last)
    def _finalize():
        eps = jnp.float32(epsilon)
        nl_f = jnp.float32(nl)

        # Padded positions (zero logits, zero labels) contribute exactly 0.5
        # each to sum(p1) and nothing to the other two sums.
        sum_p1 = acc_p1_ref[0, 0] - jnp.float32(0.5 * pad_count)
        inter1 = acc_i1_ref[0, 0]
        n1 = acc_t1_ref[0, 0]

        n0 = nl_f - n1
        sum_p0 = nl_f - sum_p1                 # sum(1 - p1)
        inter0 = nl_f - sum_p1 - n1 + inter1   # sum((1 - p1) * (1 - t1))

        w0 = 1.0 / jnp.maximum(n0 * n0, eps)
        w1 = 1.0 / jnp.maximum(n1 * n1, eps)

        intersect = w0 * inter0 + w1 * inter1
        denominator = jnp.maximum(w0 * (sum_p0 + n0) + w1 * (sum_p1 + n1), eps)

        loss = 1.0 - 2.0 * intersect / denominator
        out_ref[...] = jnp.broadcast_to(loss.astype(jnp.float32), (1, 1))


def _pick_tiles(N, Lp, max_block_elems):
    """Choose (bn, Lb): bn == N or a multiple-of-8 divisor of N; Lb a
    multiple-of-128 divisor of Lp; bn * Lb <= max_block_elems when possible."""
    cap = max(_LANE, int(max_block_elems))
    q = Lp // _LANE                    # Lp is always a multiple of 128

    bn = N
    if N * _LANE > cap and N % 8 == 0:
        r = N // 8
        r_cap = max(1, cap // (8 * _LANE))
        rb = 1
        for cand in range(min(r, r_cap), 0, -1):
            if r % cand == 0:
                rb = cand
                break
        bn = 8 * rb
    # TODO(synk): if N is huge and not 8-aligned the block may exceed the VMEM
    #             target; raise vmem_limit_bytes upstream in that case.

    d_cap = max(1, cap // (_LANE * bn))
    d = 1
    for cand in range(min(q, d_cap), 0, -1):
        if q % cand == 0:
            d = cand
            break
    return bn, _LANE * d


def generalized_dice_loss(pred, target, epsilon=1e-5, max_block_elems=None):
    """Generalized Dice Loss.

    pred   : (N, 2, L) float logits (f32 or bf16)
    target : (N, L) integer labels in {0, 1}
    Returns a float32 scalar.
    """
    N, C, L = pred.shape
    if C != 2:
        raise ValueError("GeneralizedDiceLoss here assumes 2 classes")
    assert target.shape == (N, L)

    Lp = _round_up(L, _LANE)
    pad_cols = Lp - L
    if pad_cols:
        # Fallback path (L not lane-aligned): one extra HBM pass. Keep L a
        # multiple of 128 upstream to stay on the zero-copy path.
        pred = jnp.pad(pred, ((0, 0), (0, 0), (0, pad_cols)))
        target = jnp.pad(target, ((0, 0), (0, pad_cols)))
    pad_count = N * pad_cols           # zero-logit padded positions per class

    # Free view reshape (contiguous dim merge): row n = [class0 cols | class1 cols].
    x2 = pred.reshape(N, 2 * Lp)
    tgt = target                       # original integer dtype, no wrapper cast

    bytes_per_pos = 2 * jnp.dtype(pred.dtype).itemsize + jnp.dtype(target.dtype).itemsize
    if max_block_elems is None:
        # ~6 MiB per buffer set -> ~12 MiB double-buffered (fits v5e's 16 MiB
        # default scoped VMEM); amortizes the ~0.35 us per-grid-step overhead.
        max_block_elems = (6 * 1024 * 1024) // bytes_per_pos
    bn, Lb = _pick_tiles(N, Lp, max_block_elems)

    grid = (N // bn, Lp // Lb)
    col_off = Lp // Lb                 # class-1 column-block offset

    kernel = functools.partial(
        _gdl_kernel, nl=N * L, epsilon=float(epsilon), pad_count=pad_count)

    out = pl.pallas_call(
        kernel,
        out_shape=jax.ShapeDtypeStruct((1, 1), jnp.float32),
        grid=grid,
        in_specs=[
            pl.BlockSpec((bn, Lb), lambda i, j: (i, j)),              # class 0
            pl.BlockSpec((bn, Lb), lambda i, j: (i, j + col_off)),    # class 1
            pl.BlockSpec((bn, Lb), lambda i, j: (i, j)),              # labels
        ],
        out_specs=pl.BlockSpec((1, 1), lambda i, j: (0, 0)),
        scratch_shapes=[
            pltpu.VMEM((1, 1), jnp.float32),
            pltpu.VMEM((1, 1), jnp.float32),
            pltpu.VMEM((1, 1), jnp.float32),
        ],
        compiler_params=pltpu.CompilerParams(
            dimension_semantics=("arbitrary", "arbitrary")),
    )(x2, x2, tgt)
    return out[0, 0]


def _gdl_ref(pred, target, epsilon=1e-5):
    """Pure-JAX reference mirroring the PyTorch GeneralizedDiceLoss forward."""
    p = jax.nn.softmax(pred.astype(jnp.float32), axis=1)            # (N, 2, L)
    oh = jax.nn.one_hot(target, 2, dtype=jnp.float32)               # (N, L, 2)
    oh = jnp.transpose(oh, (0, 2, 1))                               # (N, 2, L)
    pin = jnp.transpose(p, (1, 0, 2)).reshape(2, -1)                 # (2, N*L)
    tgt = jnp.transpose(oh, (1, 0, 2)).reshape(2, -1)
    target_sum = tgt.sum(-1)
    w = 1.0 / jnp.maximum(target_sum * target_sum, epsilon)
    intersect = ((pin * tgt).sum(-1) * w).sum()
    denominator = ((pin + tgt).sum(-1) * w).sum()
    return 1.0 - 2.0 * intersect / jnp.maximum(denominator, epsilon)


if __name__ == "__main__":
    key = jax.random.PRNGKey(0)
    k1, k2, k3, k4 = jax.random.split(key, 4)

    # Case 1: lane-aligned L (zero-copy main path); tiles forced small so the
    # kernel runs a multi-step grid and exercises the accumulator pattern.
    N, C, L = 2, 2, 1024
    pred = jax.random.normal(k1, (N, C, L), dtype=jnp.float32)
    target = jax.random.randint(k2, (N, L), 0, 2, dtype=jnp.int32)
    loss = generalized_dice_loss(pred, target, epsilon=1e-5, max_block_elems=2 * 256)
    jax.block_until_ready(loss)
    ref = _gdl_ref(pred, target, epsilon=1e-5)
    assert jnp.allclose(loss, ref, atol=1e-5, rtol=1e-4), (loss, ref)

    # Case 2: L not a multiple of 128 (padded fallback path, finalize correction).
    N2, L2 = 2, 500
    pred2 = jax.random.normal(k3, (N2, C, L2), dtype=jnp.float32)
    target2 = jax.random.randint(k4, (N2, L2), 0, 2, dtype=jnp.int32)
    loss2 = generalized_dice_loss(pred2, target2, epsilon=1e-5)
    jax.block_until_ready(loss2)
    ref2 = _gdl_ref(pred2, target2, epsilon=1e-5)
    assert jnp.allclose(loss2, ref2, atol=1e-5, rtol=1e-4), (loss2, ref2)

    print("KERNEL_OK")
</pallas_src>

<mosaic_0001>
module attributes {stable_mosaic.version = 11 : i64} {
  func.func @_gdl_kernel(%arg0: i32, %arg1: i32, %arg2: memref<2x256xf32, #tpu.memory_space<vmem>>, %arg3: memref<2x256xf32, #tpu.memory_space<vmem>>, %arg4: memref<2x256xi32, #tpu.memory_space<vmem>>, %arg5: memref<1x1xf32, #tpu.memory_space<vmem>>, %arg6: memref<1x1xf32, #tpu.memory_space<vmem>>, %arg7: memref<1x1xf32, #tpu.memory_space<vmem>>, %arg8: memref<1x1xf32, #tpu.memory_space<vmem>>) attributes {dimension_semantics = [#tpu.dimension_semantics<arbitrary>, #tpu.dimension_semantics<arbitrary>], iteration_bounds = array<i64: 1, 4>, scalar_prefetch = 0 : i64, scratch_operands = 3 : i64, tpu.core_type = #tpu.core_type<tc>, window_params = [{transform_indices = @transform_0, window_bounds = array<i64: 2, 256>}, {transform_indices = @transform_1, window_bounds = array<i64: 2, 256>}, {transform_indices = @transform_2, window_bounds = array<i64: 2, 256>}, {pipeline_mode = #tpu.pipeline_mode<synchronous>, transform_indices = @transform_3, window_bounds = array<i64: 1, 1>}]} {
    %c0_i32 = arith.constant 0 : i32
    %0 = arith.cmpi eq, %arg0, %c0_i32 : i32
    %c0_i32_0 = arith.constant 0 : i32
    %1 = arith.cmpi eq, %arg1, %c0_i32_0 : i32
    %2 = arith.andi %0, %1 : i1
    %c0_i32_1 = arith.constant 0 : i32
    %3 = arith.cmpi eq, %arg0, %c0_i32_1 : i32
    %c3_i32 = arith.constant 3 : i32
    %4 = arith.cmpi eq, %arg1, %c3_i32 : i32
    %5 = arith.andi %3, %4 : i1
    %6 = arith.extui %2 : i1 to i32
    %c0_i32_2 = arith.constant 0 : i32
    %7 = arith.cmpi ne, %6, %c0_i32_2 : i32
    scf.if %7 {
      %cst_29 = arith.constant 0.000000e+00 : f32
      %44 = vector.broadcast %cst_29 : f32 to vector<1x1xf32>
      %c0_30 = arith.constant 0 : index
      %c0_31 = arith.constant 0 : index
      %45 = vector.load %arg6[%c0_30, %c0_31] : memref<1x1xf32, #tpu.memory_space<vmem>>, vector<1x1xf32>
      tpu.vector_store %arg6[%c0_30, %c0_31], %44 {strides = array<i32>} : memref<1x1xf32, #tpu.memory_space<vmem>>, vector<1x1xf32>,
      %cst_32 = arith.constant 0.000000e+00 : f32
      %46 = vector.broadcast %cst_32 : f32 to vector<1x1xf32>
      %c0_33 = arith.constant 0 : index
      %c0_34 = arith.constant 0 : index
      %47 = vector.load %arg7[%c0_33, %c0_34] : memref<1x1xf32, #tpu.memory_space<vmem>>, vector<1x1xf32>
      tpu.vector_store %arg7[%c0_33, %c0_34], %46 {strides = array<i32>} : memref<1x1xf32, #tpu.memory_space<vmem>>, vector<1x1xf32>,
      %cst_35 = arith.constant 0.000000e+00 : f32
      %48 = vector.broadcast %cst_35 : f32 to vector<1x1xf32>
      %c0_36 = arith.constant 0 : index
      %c0_37 = arith.constant 0 : index
      %49 = vector.load %arg8[%c0_36, %c0_37] : memref<1x1xf32, #tpu.memory_space<vmem>>, vector<1x1xf32>
      tpu.vector_store %arg8[%c0_36, %c0_37], %48 {strides = array<i32>} : memref<1x1xf32, #tpu.memory_space<vmem>>, vector<1x1xf32>,
    } else {
    }
    %c0 = arith.constant 0 : index
    %c0_3 = arith.constant 0 : index
    %8 = vector.load %arg2[%c0, %c0_3] : memref<2x256xf32, #tpu.memory_space<vmem>>, vector<2x256xf32>
    %c0_4 = arith.constant 0 : index
    %c0_5 = arith.constant 0 : index
    %9 = vector.load %arg3[%c0_4, %c0_5] : memref<2x256xf32, #tpu.memory_space<vmem>>, vector<2x256xf32>
    %c0_6 = arith.constant 0 : index
    %c0_7 = arith.constant 0 : index
    %10 = vector.load %arg4[%c0_6, %c0_7] : memref<2x256xi32, #tpu.memory_space<vmem>>, vector<2x256xi32>
    %11 = arith.sitofp %10 : vector<2x256xi32> to vector<2x256xf32>
    %12 = arith.subf %9, %8 : vector<2x256xf32>
    %cst = arith.constant 5.000000e-01 : f32
    %13 = vector.broadcast %cst : f32 to vector<2x256xf32>
    %14 = arith.mulf %13, %12 : vector<2x256xf32>
    %15 = math.tanh %14 : vector<2x256xf32>
    %cst_8 = arith.constant 5.000000e-01 : f32
    %16 = vector.broadcast %cst_8 : f32 to vector<2x256xf32>
    %17 = arith.mulf %16, %15 : vector<2x256xf32>
    %cst_9 = arith.constant 5.000000e-01 : f32
    %18 = vector.broadcast %cst_9 : f32 to vector<2x256xf32>
    %19 = arith.addf %17, %18 : vector<2x256xf32>
    %c0_10 = arith.constant 0 : index
    %c0_11 = arith.constant 0 : index
    %20 = vector.load %arg6[%c0_10, %c0_11] : memref<1x1xf32, #tpu.memory_space<vmem>>, vector<1x1xf32>
    %cst_12 = arith.constant dense<0.000000e+00> : vector<256xf32>
    %21 = vector.multi_reduction <add>, %19, %cst_12 [0] : vector<2x256xf32> to vector<256xf32>
    %22 = vector.shape_cast %21 : vector<256xf32> to vector<1x256xf32>
    %cst_13 = arith.constant dense<0.000000e+00> : vector<1xf32>
    %23 = vector.multi_reduction <add>, %22, %cst_13 [1] : vector<1x256xf32> to vector<1xf32>
    %24 = vector.shape_cast %23 : vector<1xf32> to vector<1x1xf32>
    %25 = arith.addf %20, %24 : vector<1x1xf32>
    %c0_14 = arith.constant 0 : index
    %c0_15 = arith.constant 0 : index
    %26 = vector.load %arg6[%c0_14, %c0_15] : memref<1x1xf32, #tpu.memory_space<vmem>>, vector<1x1xf32>
    tpu.vector_store %arg6[%c0_14, %c0_15], %25 {strides = array<i32>} : memref<1x1xf32, #tpu.memory_space<vmem>>, vector<1x1xf32>,
    %c0_16 = arith.constant 0 : index
    %c0_17 = arith.constant 0 : index
    %27 = vector.load %arg7[%c0_16, %c0_17] : memref<1x1xf32, #tpu.memory_space<vmem>>, vector<1x1xf32>
    %28 = arith.mulf %19, %11 : vector<2x256xf32>
    %cst_18 = arith.constant dense<0.000000e+00> : vector<256xf32>
    %29 = vector.multi_reduction <add>, %28, %cst_18 [0] : vector<2x256xf32> to vector<256xf32>
    %30 = vector.shape_cast %29 : vector<256xf32> to vector<1x256xf32>
    %cst_19 = arith.constant dense<0.000000e+00> : vector<1xf32>
    %31 = vector.multi_reduction <add>, %30, %cst_19 [1] : vector<1x256xf32> to vector<1xf32>
    %32 = vector.shape_cast %31 : vector<1xf32> to vector<1x1xf32>
    %33 = arith.addf %27, %32 : vector<1x1xf32>
    %c0_20 = arith.constant 0 : index
    %c0_21 = arith.constant 0 : index
    %34 = vector.load %arg7[%c0_20, %c0_21] : memref<1x1xf32, #tpu.memory_space<vmem>>, vector<1x1xf32>
    tpu.vector_store %arg7[%c0_20, %c0_21], %33 {strides = array<i32>} : memref<1x1xf32, #tpu.memory_space<vmem>>, vector<1x1xf32>,
    %c0_22 = arith.constant 0 : index
    %c0_23 = arith.constant 0 : index
    %35 = vector.load %arg8[%c0_22, %c0_23] : memref<1x1xf32, #tpu.memory_space<vmem>>, vector<1x1xf32>
    %cst_24 = arith.constant dense<0.000000e+00> : vector<256xf32>
    %36 = vector.multi_reduction <add>, %11, %cst_24 [0] : vector<2x256xf32> to vector<256xf32>
    %37 = vector.shape_cast %36 : vector<256xf32> to vector<1x256xf32>
    %cst_25 = arith.constant dense<0.000000e+00> : vector<1xf32>
    %38 = vector.multi_reduction <add>, %37, %cst_25 [1] : vector<1x256xf32> to vector<1xf32>
    %39 = vector.shape_cast %38 : vector<1xf32> to vector<1x1xf32>
    %40 = arith.addf %35, %39 : vector<1x1xf32>
    %c0_26 = arith.constant 0 : index
    %c0_27 = arith.constant 0 : index
    %41 = vector.load %arg8[%c0_26, %c0_27] : memref<1x1xf32, #tpu.memory_space<vmem>>, vector<1x1xf32>
    tpu.vector_store %arg8[%c0_26, %c0_27], %40 {strides = array<i32>} : memref<1x1xf32, #tpu.memory_space<vmem>>, vector<1x1xf32>,
    %42 = arith.extui %5 : i1 to i32
    %c0_i32_28 = arith.constant 0 : i32
    %43 = arith.cmpi ne, %42, %c0_i32_28 : i32
    scf.if %43 {
      %c0_29 = arith.constant 0 : index
      %c0_30 = arith.constant 0 : index
      %44 = vector.load %arg6[%c0_29, %c0_30] : memref<1x1xf32, #tpu.memory_space<vmem>>, vector<1x1xf32>
      %45 = vector.extract %44[0, 0] : f32 from vector<1x1xf32>
      %cst_31 = arith.constant 0.000000e+00 : f32
      %46 = arith.subf %45, %cst_31 : f32
      %c0_32 = arith.constant 0 : index
      %c0_33 = arith.constant 0 : index
      %47 = vector.load %arg7[%c0_32, %c0_33] : memref<1x1xf32, #tpu.memory_space<vmem>>, vector<1x1xf32>
      %48 = vector.extract %47[0, 0] : f32 from vector<1x1xf32>
      %c0_34 = arith.constant 0 : index
      %c0_35 = arith.constant 0 : index
      %49 = vector.load %arg8[%c0_34, %c0_35] : memref<1x1xf32, #tpu.memory_space<vmem>>, vector<1x1xf32>
      %50 = vector.extract %49[0, 0] : f32 from vector<1x1xf32>
      %cst_36 = arith.constant 2.048000e+03 : f32
      %51 = arith.subf %cst_36, %50 : f32
      %cst_37 = arith.constant 2.048000e+03 : f32
      %52 = arith.subf %cst_37, %46 : f32
      %cst_38 = arith.constant 2.048000e+03 : f32
      %53 = arith.subf %cst_38, %46 : f32
      %54 = arith.subf %53, %50 : f32
      %55 = arith.addf %54, %48 : f32
      %56 = arith.mulf %51, %51 : f32
      %cst_39 = arith.constant 9.99999974E-6 : f32
      %57 = arith.maximumf %56, %cst_39 : f32
      %cst_40 = arith.constant 1.000000e+00 : f32
      %58 = arith.divf %cst_40, %57 : f32
      %59 = arith.mulf %50, %50 : f32
      %cst_41 = arith.constant 9.99999974E-6 : f32
      %60 = arith.maximumf %59, %cst_41 : f32
      %cst_42 = arith.constant 1.000000e+00 : f32
      %61 = arith.divf %cst_42, %60 : f32
      %62 = arith.mulf %58, %55 : f32
      %63 = arith.mulf %61, %48 : f32
      %64 = arith.addf %62, %63 : f32
      %65 = arith.addf %52, %51 : f32
      %66 = arith.mulf %58, %65 : f32
      %67 = arith.addf %46, %50 : f32
      %68 = arith.mulf %61, %67 : f32
      %69 = arith.addf %66, %68 : f32
      %cst_43 = arith.constant 9.99999974E-6 : f32
      %70 = arith.maximumf %69, %cst_43 : f32
      %cst_44 = arith.constant 2.000000e+00 : f32
      %71 = arith.mulf %cst_44, %64 : f32
      %72 = arith.divf %71, %70 : f32
      %cst_45 = arith.constant 1.000000e+00 : f32
      %73 = arith.subf %cst_45, %72 : f32
      %74 = vector.broadcast %73 : f32 to vector<1x1xf32>
      %c0_46 = arith.constant 0 : index
      %c0_47 = arith.constant 0 : index
      %75 = vector.load %arg5[%c0_46, %c0_47] : memref<1x1xf32, #tpu.memory_space<vmem>>, vector<1x1xf32>
      tpu.vector_store %arg5[%c0_46, %c0_47], %74 {strides = array<i32>} : memref<1x1xf32, #tpu.memory_space<vmem>>, vector<1x1xf32>,
    } else {
    }
    return
  }
  func.func @transform_0(%arg0: i32, %arg1: i32) -> (i32, i32) {
    %c0_i32 = arith.constant 0 : i32
    return %arg0, %arg1 : i32, i32
  }
  func.func @transform_1(%arg0: i32, %arg1: i32) -> (i32, i32) {
    %c4_i32 = arith.constant 4 : i32
    %0 = arith.addi %arg1, %c4_i32 : i32
    %c0_i32 = arith.constant 0 : i32
    return %arg0, %0 : i32, i32
  }
  func.func @transform_2(%arg0: i32, %arg1: i32) -> (i32, i32) {
    %c0_i32 = arith.constant 0 : i32
    return %arg0, %arg1 : i32, i32
  }
  func.func @transform_3(%arg0: i32, %arg1: i32) -> (i32, i32) {
    %c0_i32 = arith.constant 0 : i32
    %c0_i32_0 = arith.constant 0 : i32
    %c0_i32_1 = arith.constant 0 : i32
    return %c0_i32, %c0_i32_0 : i32, i32
  }
}

</mosaic_0001>

<bundles_post_ra>
// kernel: tpu_custom_call.1
= control target key start
LH: loop header
LB: loop body
LE: loop exit
PB: predicated region body
PF: predicated region fallthrough
CT: control target
= control target key end

     0   :  { %s1251_s0 = inlined_call_operand.hbm [shape: f32[2,2048], index: 0, kind: input, shape index: {}]   ;;  %s1252_s1 = inlined_call_operand.hbm [shape: f32[2,2048], index: 1, kind: input, shape index: {}]   ;;  %s1253_s2 = inlined_call_operand.hbm [shape: s32[2,1024], index: 2, kind: input, shape index: {}]   ;;  %s1254_s3 = inlined_call_operand.hbm [shape: f32[1,1], index: 3, kind: output, shape index: {}]  }
   0x1   :  { %1262 = sst [smem:[#allocation18_spill]] %s1251_s0 }
   0x2   :  { %1263 = sst [smem:[#allocation19_spill]] %s1252_s1 }
   0x3   :  { %1264 = sst [smem:[#allocation20_spill]] %s1253_s2 }
   0x4   :  { %8 = vsyncpa [#allocation6], 0 }
   0x5   :  { %10 = vsyncpa [#allocation6 + $0x1], 0 }
   0x6   :  { %11 = vsyncpa [#allocation9], 0 }
   0x7   :  { %13 = vsyncpa [#allocation9 + $0x1], 0 }
   0x8   :  { %14 = vsyncpa [#allocation7], 0  ;;  %s933_s12 = smov 0   ;;  %s935_s13 = smov 0  }
   0x9   :  { %s937_s14 = smov 0   ;;  %s939_s15 = smov 0  }
   0xa   :  { %s941_s16 = smov 0   ;;  %s943_s17 = smov 0  }
   0xb   :  { %s945_s18 = smov 0   ;;  %s947_s19 = smov 0  }
   0xc   :  { %s949_s20 = smov 0  }
   0xd LB: > { %1265 = sst [smem:[#allocation16_spill]] %s900_s19  ;;  %s977_s21 = sadd.s32 4294967295, %s904_s20   ;;  %s904_s20 = sphi %s949_s20, %s20_s20   ;;  %s900_s19 = sphi %s947_s19, %s1286_s19   ;;  %s896_s18 = sphi %s945_s18, %s1285_s18   ;;  %s892_s17 = sphi %s943_s17, %s1292_s17   ;;  %s888_s16 = sphi %s941_s16, %s1291_s16   ;;  %s884_s15 = sphi %s939_s15, %s1290_s15   ;;  %s880_s14 = sphi %s937_s14, %s1289_s14   ;;  %s876_s13 = sphi %s935_s13, %s1288_s13   ;;  %s872_s12 = sphi %s933_s12, %s1287_s12  }
   0xe   : > { %s29_s22 = sadd.s32 1, %s900_s19  ;;  %p1257_p1 = scmp.eq.s32.totalorder %s904_s20, 0 }
   0xf   : > { %p30_p0 = scmp.ge.s32.totalorder %s29_s22, 4  ;;  %p1256_p2 = scmp.eq.s32.totalorder %s977_s21, 0 }
  0x10   : > { %s64_s23 = sadd.s32 4, %s900_s19  ;;  %s71_s24 = sadd.s32 1, %s880_s14 }
  0x11   : > { %s1294_s22 = smov (%p30_p0, %s29_s22), 0  ;;  %p78_p3 = scmp.ne.s32.totalorder %s880_s14, %s876_s13 }
  0x12   : > { %1266 = sst [smem:[#allocation17_spill]] %s1294_s22  ;;  %s37_s25 = ssub.s32 %s900_s19, %s1294_s22 }
  0x13   : > { %s65_s26 = sadd.s32 4, %s1294_s22  ;;  %p991_p4 = scmp.eq.s32.totalorder %s37_s25, 0 }
  0x14   : > { %s67_s28 = ssub.s32 %s64_s23, %s65_s26  ;;  %p997_p6 = por %p78_p3, %p1257_p1 }
  0x15   : > { %p69_p5 = scmp.eq.s32.totalorder %s67_s28, 0  ;;  %p84_p7 = scmp.ne.s32.totalorder %s876_s13, %s872_s12 }
  0x16   : > { %p1255_p9 = scmp.lt.s32.totalorder %s904_s20, 4  ;;  %s1013_s5 = sshll.u32 %s900_s19, 6 }
  0x17   : > { %s1003_s30 = scalar_select %p69_p5, %s880_s14, %s71_s24  }
  0x18   : > { %p1007_p8 = por %p84_p7, %p1256_p2  ;;  %s178_s6 = sand.u32 1, %s904_s20  }
  0x19   : > { %s180_s7 = sand.u32 1, %s880_s14   ;;  %s1270_s1 = sld [smem:[#allocation19_spill]] }
  0x1a   : > { %s1269_s4 = scalar_select %p1007_p8, 1, 0 }
  0x1b   : > { %s561_s8 = sshll.u32 %s180_s7, 2  ;;  %p1027_p10 = pnand %p1255_p9, %p997_p6 }
  0x1c   : > { %s182_s12 = scalar_lea.vmem [#allocation8], %s561_s8  ;;  %s1035_s26 = scalar_lea.sflag [#allocation9], %s178_s6 }
  0x1d   : > { %s193_s24 = sshll.u32 %s182_s12, 4  ;;  %p703_p0 = pneg %p1027_p10  ;;  %s1031_s24 = int_to_ptr.vmem [resolvable:$true] %s193_s24 }
  0x1f   : > { %s480_s11 = scalar_lea.hbm %s1270_s1, %s1013_s5  ;;  %s706_s8 = scalar_lea.hbm %s1270_s1, 512 }
  0x20   : > { %s1021_s23 = scalar_lea.hbm %s480_s11, 256  ;;  %s731_s28 = scalar_lea.hbm %s480_s11, 320 }
  0x21   : > { %p702_p13 = scmp.ne.s32.totalorder %s1021_s23, %s731_s28  ;;  %p707_p6 = scmp.lt.u32.totalorder %s1021_s23, %s1270_s1 }
  0x22   : > { %p708_p7 = scmp.lt.u32.totalorder %s706_s8, %s731_s28  ;;  %p710_p2 = scmp.lt.u32.totalorder %s731_s28, %s1021_s23 }
  0x23   : > { %p704_p3 = pnand %p703_p0, %p702_p13 }
  0x24   : > { %p709_p9 = por %p708_p7, %p707_p6 }
  0x25   : > { %p705_p5 = pneg %p704_p3 }
  0x26   : > { %p711_p1 = por %p710_p2, %p709_p9 }
  0x28   : > { %p712_p11 = pnand %p711_p1, %p705_p5 }
  0x2a   : > { %715 = shalt.err (!%p712_p11)
}
  0x2b   : > { %s716_s6 = scalar_lea.vmem %s1031_s24, 64  ;;  %s906_s11 = smov [#allocation8]  }
  0x2c   : > { %p717_p13 = scmp.ne.s32.totalorder %s1031_s24, %s716_s6  ;;  %s721_s12 = sshll.u32 %s906_s11, 4  ;;  %s722_s12 = int_to_ptr.vmem [resolvable:$false] %s721_s12 }
  0x2d   : > { %s723_s29 = scalar_lea.vmem %s722_s12, 128  ;;  %p724_p8 = scmp.lt.s32.totalorder %s1031_s24, %s722_s12 }
  0x2e   : > { %p719_p3 = pnand %p717_p13, %p703_p0  ;;  %p725_p6 = scmp.lt.s32.totalorder %s723_s29, %s716_s6 }
  0x30   : > { %p720_p12 = pneg %p719_p3  ;;  %p726_p7 = por %p725_p6, %p724_p8 }
  0x32   : > { %p727_p2 = pnand %p726_p7, %p720_p12 }
  0x34   : > { %730 = shalt.err (!%p727_p2)
}
  0x35   : > { %610 = dma.hbm_to_vmem [thread:$0]  (!%p1027_p10), %s1021_s23, 64, %s1031_s24, %s1035_s26  }
  0x36   : > { %p1272_p1 = scmp.lt.s32.totalorder %s904_s20, 5  ;;  %p1273_p8 = scmp.ge.s32.totalorder %s904_s20, 1 }
  0x37   : > { %s41_s28 = sadd.s32 1, %s892_s17  ;;  %p48_p11 = scmp.ne.s32.totalorder %s892_s17, %s888_s16 }
  0x38   : > { %p1066_p9 = pnand %p1273_p8, %p1272_p1  ;;  %p54_p12 = scmp.ne.s32.totalorder %s888_s16, %s884_s15 }
  0x39   : > { %s1074_s7 = scalar_select %p991_p4, %s892_s17, %s41_s28  }
  0x3a   : > { %s1274_s25 = scalar_select %p1066_p9, 1, 0 }
  0x3b   : > { %s157_s8 = sand.u32 1, %s892_s17   ;;  %s1275_s0 = sld [smem:[#allocation18_spill]] }
  0x3c   : > { %p1276_p0 = scmp.eq.s32.totalorder %s904_s20, 0  ;;  %p1277_p5 = scmp.eq.s32.totalorder %s977_s21, 0 }
  0x3d   : > { %s1095_s27 = sshll.u32 %s157_s8, 2  ;;  %p1279_p4 = scmp.lt.s32.totalorder %s904_s20, 4 }
  0x3e   : > { %p50_p10 = por %p1276_p0, %p48_p11  ;;  %p1091_p13 = por %p1277_p5, %p54_p12 }
  0x3f   : > { %s161_s24 = scalar_lea.vmem [#allocation5], %s1095_s27  ;;  %s158_s12 = scalar_lea.sflag [#allocation6], %s157_s8 }
  0x40   : > { %s1278_s23 = scalar_select %p1091_p13, 1, 0 }
  0x41   : > { %s1085_s6 = scalar_lea.hbm %s1275_s0, %s1013_s5  ;;  %p1099_p3 = pnand %p1279_p4, %p50_p10 }
  0x42   : > { %s171_s11 = sshll.u32 %s161_s24, 4  ;;  %s732_s29 = scalar_lea.hbm %s1085_s6, 64  ;;  %s1104_s11 = int_to_ptr.vmem [resolvable:$true] %s171_s11 }
  0x43   : > { %p733_p6 = scmp.ne.s32.totalorder %s1085_s6, %s732_s29  ;;  %p734_p7 = pneg %p1099_p3 }
  0x44   : > { %s737_s10 = scalar_lea.hbm %s1275_s0, 512  ;;  %p738_p8 = scmp.lt.u32.totalorder %s1085_s6, %s1275_s0 }
  0x45   : > { %p735_p2 = pnand %p734_p7, %p733_p6  ;;  %p739_p11 = scmp.lt.u32.totalorder %s737_s10, %s732_s29 }
  0x46   : > { %p741_p0 = scmp.lt.u32.totalorder %s732_s29, %s1085_s6 }
  0x47   : > { %p736_p1 = pneg %p735_p2  ;;  %p740_p12 = por %p739_p11, %p738_p8 }
  0x49   : > { %p742_p10 = por %p741_p0, %p740_p12 }
  0x4b   : > { %p743_p5 = pnand %p742_p10, %p736_p1 }
  0x4d   : > { %746 = shalt.err (!%p743_p5)
}
  0x4e   : > { %s747_s8 = scalar_lea.vmem %s1104_s11, 64  ;;  %s907_s24 = smov [#allocation5]  }
  0x4f   : > { %p748_p4 = scmp.ne.s32.totalorder %s1104_s11, %s747_s8  ;;  %s752_s28 = sshll.u32 %s907_s24, 4  ;;  %s753_s28 = int_to_ptr.vmem [resolvable:$false] %s752_s28 }
  0x50   : > { %s754_s1 = scalar_lea.vmem %s753_s28, 128  ;;  %p755_p13 = scmp.lt.s32.totalorder %s1104_s11, %s753_s28 }
  0x51   : > { %p750_p6 = pnand %p748_p4, %p734_p7  ;;  %p756_p8 = scmp.lt.s32.totalorder %s754_s1, %s747_s8 }
  0x53   : > { %p751_p2 = pneg %p750_p6  ;;  %p757_p11 = por %p756_p8, %p755_p13 }
  0x55   : > { %p758_p12 = pnand %p757_p11, %p751_p2 }
  0x57   : > { %761 = shalt.err (!%p758_p12)
}
  0x58   : > { %607 = dma.hbm_to_vmem [thread:$0]  (!%p1099_p3), %s1085_s6, 64, %s1104_s11, %s158_s12  }
  0x59   : > { %s1281_s2 = sld [smem:[#allocation20_spill]]  ;;  %s204_s10 = scalar_lea.vmem [#allocation10], %s1095_s27 }
  0x5a   : > { %s214_s8 = sshll.u32 %s204_s10, 4  ;;  %s215_s8 = int_to_ptr.vmem [resolvable:$true] %s214_s8 }
  0x5f   : > { %s1135_s9 = scalar_lea.hbm %s1281_s2, %s1013_s5  ;;  %s767_s11 = scalar_lea.hbm %s1281_s2, 256 }
  0x60   : > { %s762_s24 = scalar_lea.hbm %s1135_s9, 64  ;;  %p768_p10 = scmp.lt.u32.totalorder %s1135_s9, %s1281_s2 }
  0x61   : > { %p763_p13 = scmp.ne.s32.totalorder %s1135_s9, %s762_s24  ;;  %p769_p5 = scmp.lt.u32.totalorder %s767_s11, %s762_s24 }
  0x62   : > { %p771_p6 = scmp.lt.u32.totalorder %s762_s24, %s1135_s9 }
  0x63   : > { %p765_p1 = pnand %p763_p13, %p734_p7  ;;  %p770_p4 = por %p769_p5, %p768_p10 }
  0x65   : > { %p766_p0 = pneg %p765_p1  ;;  %p772_p2 = por %p771_p6, %p770_p4 }
  0x67   : > { %p773_p8 = pnand %p772_p2, %p766_p0 }
  0x69   : > { %776 = shalt.err (!%p773_p8)
}
  0x6a   : > { %s777_s27 = scalar_lea.vmem %s215_s8, 64  ;;  %s908_s1 = smov [#allocation10]  }
  0x6b   : > { %p778_p11 = scmp.ne.s32.totalorder %s215_s8, %s777_s27  ;;  %s782_s22 = sshll.u32 %s908_s1, 4  ;;  %s783_s22 = int_to_ptr.vmem [resolvable:$false] %s782_s22 }
  0x6c   : > { %s784_s29 = scalar_lea.vmem %s783_s22, 128  ;;  %p785_p1 = scmp.lt.s32.totalorder %s215_s8, %s783_s22 }
  0x6d   : > { %p780_p12 = pnand %p778_p11, %p734_p7  ;;  %p786_p9 = scmp.lt.s32.totalorder %s784_s29, %s777_s27 }
  0x6f   : > { %p781_p13 = pneg %p780_p12  ;;  %p787_p5 = por %p786_p9, %p785_p1 }
  0x71   : > { %p788_p10 = pnand %p787_p5, %p781_p13 }
  0x73   : > { %791 = shalt.err (!%p788_p10)
}
  0x74   : > { %613 = dma.hbm_to_vmem [thread:$0]  (!%p1099_p3), %s1135_s9, 64, %s215_s8, %s1035_s26  }
  0x75   : > { %p1282_p0 = scmp.ne.s32.totalorder %s1274_s25, 0 }
  0x76   : > { %s225_s10 = sand.u32 (!%p1282_p0), 1, %s888_s16   ;;  %p1283_p7 = scmp.ne.s32.totalorder (!%p1282_p0), %s1278_s23, 0 }
  0x77   : > { %223 = sbr.rel (%p1282_p0) target bundleno = 555 (0x22b), region = 32  ;;  %s1161_s24 = sshll.u32 (!%p1282_p0), %s225_s10, 2 }
  0x78   : > { %s226_s28 = scalar_lea.sflag (!%p1282_p0), [#allocation6], %s225_s10  ;;  %s229_s6 = scalar_lea.vmem (!%p1282_p0), [#allocation5], %s1161_s24 }
  0x7e   : > { %855 = dma.done.wait (%p1283_p7), %s226_s28, 64  }
  0x7f   : > { %857 = vsyncadd (%p1283_p7), %s226_s28, 4294967232  ;;  %s234_s26 = sand.u32 1, %s977_s21   ;;  %s236_s15 = sand.u32 1, %s876_s13  }
  0x80   : > { %s569_s25 = sshll.u32 %s236_s15, 2  ;;  %s235_s9 = scalar_lea.sflag [#allocation9], %s234_s26 }
  0x81   : > { %s238_s8 = scalar_lea.vmem [#allocation8], %s569_s25  ;;  %p1284_p9 = scmp.ne.s32.totalorder %s1269_s4, 0 }
  0x83   : > { %859 = dma.done.wait (%p1284_p9), %s235_s9, 64  }
  0x84   : > { %861 = vsyncadd (%p1284_p9), %s235_s9, 4294967232  ;;  %s247_s11 = scalar_lea.vmem [#allocation10], %s1161_s24 }
  0x85   : > { %863 = dma.done.wait (%p1283_p7), %s235_s9, 64  }
  0x86   : > { %865 = vsyncadd (%p1283_p7), %s235_s9, 4294967232  ;;  %p280_p3 = scmp.eq.s32.totalorder %s896_s18, 0  ;;  %p283_p4 = scmp.eq.s32.totalorder %s896_s18, 3 }
  0x87   : > { %vm288_vm0 = vcmask (%p280_p3), 0   ;;  %v909_v0 = vmov (%p280_p3), 0.0  }
  0x88   : > { %287 = sbr.rel (!%p280_p3) target bundleno = 143 (0x8f), region = 48  ;;  %289 = vst.msk [vmem:[#allocation2] sm:$0x1] (%p280_p3), %vm288_vm0, %v909_v0  ;;  %290 = vst.msk [vmem:[#allocation3] sm:$0x1] (%p280_p3), %vm288_vm0, %v909_v0 }
  0x89   : > { %291 = vst.msk [vmem:[#allocation4] sm:$0x1] (%p280_p3), %vm288_vm0, %v909_v0 }
  0x8f PF: > { %v292_v1 = vld [vmem:[%s229_s6] sm:$0xf]  ;;  %v293_v2 = vld [vmem:[%s238_s8] sm:$0xf]  ;;  %v306_v3 = vlaneseq  ;;  %v910_v5 = vmov 1983009808  }
  0x90   : > { %v296_v4 = vsub.f32 %v293_v2, %v292_v1  ;;  %v304_v6 = vunpack.c.l.s4 %v910_v5  ;;  %v294_v8 = vld [vmem:[%s247_s11] sm:$0xf]  ;;  %vm313_vm1 = vcmask 1041408   ;;  %vm332_vm2 = vcmask 0   ;;  %s911_s29 = smov (%p283_p4), 1e-05  }
  0x91   : > { %v307_v7 = vshrl.u32 %v306_v3, 7  ;;  %v295_v12 = vcvt.s32.f32 %v294_v8 }
  0x92   : > { %v297_v9 = vmul.f32 0.5, %v296_v4  ;;  %v305_v10 = vunpack.c.0.s8 %v304_v6  ;;  %v366_v4 = vld [vmem:[#allocation4] sm:$0x1] }
  0x94   : > { %693 = vtanh.f32 %v297_v9  ;;  %v308_v11 = vsub.s32 %v305_v10, %v307_v7  ;;  %v301_v7 = vld [vmem:[#allocation2] sm:$0x1]  ;;  %v334_v10 = vld [vmem:[#allocation3] sm:$0x1] }
  0x96   : > { %v374_v13 = vrot.slane %v295_v12, %v308_v11 }
  0x98   : > { %v375_v14 = vcombine.high %v374_v13, %v374_v13  ;;  %v378_v15 = vsel %vm313_vm1, %v374_v13, 0.0 }
  0x99   : > { %v379_v16 = vrot.slane %v378_v15, 4 }
  0x9a   : > { %v385_v17 = vsel %vm313_vm1, %v375_v14, 0.0 }
  0x9b   : > { %v380_v18 = vadd.f32 %v379_v16, %v378_v15  ;;  %v386_v19 = vrot.slane %v385_v17, 4 }
  0x9d   : > { %v381_v20 = vrot.slane %v380_v18, 2  ;;  %v387_v21 = vadd.f32 %v386_v19, %v385_v17 }
  0x9e   : > { %v694_v22 = vpop.eup %693 }
  0x9f   : > { %v299_v23 = vmul.f32 0.5, %v694_v22  ;;  %v382_v24 = vadd.f32 %v381_v20, %v380_v18  ;;  %v388_v25 = vrot.slane %v387_v21, 2 }
  0xa1   : > { %v300_v26 = vadd.f32 0.5, %v299_v23  ;;  %v383_v27 = vrot.slane %v382_v24, 1  ;;  %v389_v28 = vadd.f32 %v388_v25, %v387_v21 }
  0xa3   : > { %v309_v29 = vrot.slane %v300_v26, %v308_v11  ;;  %v384_v30 = vadd.f32 %v383_v27, %v382_v24  ;;  %v390_v31 = vrot.slane %v389_v28, 1  ;;  %v335_v32 = vmul.f32 %v300_v26, %v295_v12 }
  0xa5   : > { %v310_v33 = vcombine.high %v309_v29, %v309_v29  ;;  %v314_v34 = vsel %vm313_vm1, %v309_v29, 0.0  ;;  %v391_v35 = vadd.f32 %v390_v31, %v389_v28  ;;  %v343_v36 = vrot.slane %v335_v32, %v308_v11 }
  0xa6   : > { %v315_v37 = vrot.slane %v314_v34, 4 }
  0xa7   : > { %v321_v38 = vsel %vm313_vm1, %v310_v33, 0.0  ;;  %v392_v39 = vadd.f32 %v391_v35, %v384_v30  ;;  %v344_v40 = vcombine.high %v343_v36, %v343_v36  ;;  %v347_v41 = vsel %vm313_vm1, %v343_v36, 0.0 }
  0xa8   : > { %v316_v42 = vadd.f32 %v315_v37, %v314_v34  ;;  %v322_v43 = vrot.slane %v321_v38, 4  ;;  %v348_v44 = vrot.slane %v347_v41, 4 }
  0xa9   : > { %393 = vadd.xlane.f32.xlu1 %v392_v39  ;;  %v354_v45 = vsel %vm313_vm1, %v344_v40, 0.0 }
  0xaa   : > { %v317_v46 = vrot.slane %v316_v42, 2  ;;  %v323_v47 = vadd.f32 %v322_v43, %v321_v38  ;;  %v349_v48 = vadd.f32 %v348_v44, %v347_v41  ;;  %v355_v49 = vrot.slane %v354_v45, 4 }
  0xac   : > { %v318_v50 = vadd.f32 %v317_v46, %v316_v42  ;;  %v324_v51 = vrot.slane %v323_v47, 2  ;;  %v350_v52 = vrot.slane %v349_v48, 2  ;;  %v356_v53 = vadd.f32 %v355_v49, %v354_v45 }
  0xae   : > { %v319_v54 = vrot.slane %v318_v50, 1  ;;  %v325_v55 = vadd.f32 %v324_v51, %v323_v47  ;;  %v351_v56 = vadd.f32 %v350_v52, %v349_v48  ;;  %v357_v57 = vrot.slane %v356_v53, 2 }
  0xb0   : > { %v320_v58 = vadd.f32 %v319_v54, %v318_v50  ;;  %v326_v59 = vrot.slane %v325_v55, 1  ;;  %v352_v60 = vrot.slane %v351_v56, 1  ;;  %v358_v61 = vadd.f32 %v357_v57, %v356_v53 }
  0xb2   : > { %v327_v62 = vadd.f32 %v326_v59, %v325_v55  ;;  %v353_v63 = vadd.f32 %v352_v60, %v351_v56  ;;  %v359_v0 = vrot.slane %v358_v61, 1 }
  0xb4   : > { %v328_v1 = vadd.f32 %v327_v62, %v320_v58  ;;  %v360_v2 = vadd.f32 %v359_v0, %v358_v61 }
  0xb6   : > { %329 = vadd.xlane.f32.xlu0 %v328_v1  ;;  %v361_v3 = vadd.f32 %v360_v2, %v353_v63 }
  0xba   : > { %362 = vadd.xlane.f32.xlu0 %v361_v3 }
 0x136   : > { %v394_v5 = vpop.xlane.xlu1 %393 }
 0x137   : > { %v395_v6 = vadd.f32 %v394_v5, %v366_v4 }
 0x139   : > { %396 = vst.msk [vmem:[#allocation4] sm:$0x1] %vm332_vm2, %v395_v6 }
 0x140   : > { %v403_v15 = vld [vmem:[#allocation4] sm:$0x1] (%p283_p4) }
 0x143   : > { %v330_v8 = vpop.xlane.xlu0 %329 }
 0x144   : > { %v331_v9 = vadd.f32 %v330_v8, %v301_v7  ;;  %398 = sbr.rel (!%p283_p4) target bundleno = 530 (0x212), region = 52 }
 0x146   : > { %333 = vst.msk [vmem:[#allocation2] sm:$0x1] %vm332_vm2, %v331_v9 }
 0x147   : > { %v363_v11 = vpop.xlane.xlu0 %362 }
 0x148   : > { %v364_v12 = vadd.f32 %v363_v11, %v334_v10 }
 0x14a   : > { %365 = vst.msk [vmem:[#allocation3] sm:$0x1] %vm332_vm2, %v364_v12 }
 0x14d   : > { %v399_v13 = vld [vmem:[#allocation2] sm:$0x1] }
 0x14e   : > { %582 = vpush %v399_v13 }
 0x151   : > { %v401_v14 = vld [vmem:[#allocation3] sm:$0x1] }
 0x152   : > { %584 = vpush %v401_v14 }
 0x153   : > { %586 = vpush %v403_v15 }
 0x17f   : > { %s1192_s4 = spop %582 }
 0x180   : > { %s406_s12 = ssub.f32 2048.0, %s1192_s4 }
 0x183   : > { %s1194_s23 = spop %584 }
 0x184   : > { %s587_s5 = spop %586 }
 0x185   : > { %s405_s27 = ssub.f32 2048.0, %s587_s5  ;;  %s414_s1 = smul.f32 %s587_s5, %s587_s5 }
 0x186   : > { %s424_s15 = sadd.f32 %s587_s5, %s1192_s4 }
 0x187   : > { %s409_s22 = smul.f32 %s405_s27, %s405_s27  ;;  %s415_s18 = smax.f32 %s911_s29, %s414_s1 }
 0x188   : > { %v416_v16 = vstv %s415_s18  ;;  %s422_s24 = sadd.f32 %s406_s12, %s405_s27 }
 0x189   : > { %s410_s10 = smax.f32 %s911_s29, %s409_s22  ;;  %s407_s11 = ssub.f32 %s406_s12, %s587_s5 }
 0x18a   : > { %v411_v17 = vstv %s410_s10 }
 0x18b   : > { %695 = vrcp.f32 %v411_v17  ;;  %s408_s27 = sadd.f32 %s1194_s23, %s407_s11 }
 0x18c   : > { %697 = vrcp.f32 %v416_v16 }
 0x195   : > { %v696_v18 = vpop.eup %695 }
 0x196   : > { %v698_v19 = vpop.eup %697  ;;  %588 = vpush %v696_v18 }
 0x197   : > { %590 = vpush %v698_v19 }
 0x1c7   : > { %s589_s28 = spop %588 }
 0x1c8   : > { %s591_s6 = spop %590  ;;  %s423_s26 = smul.f32 %s589_s28, %s422_s24 }
 0x1c9   : > { %s425_s25 = smul.f32 %s591_s6, %s424_s15 }
 0x1ca   : > { %s419_s1 = smul.f32 %s589_s28, %s408_s27 }
 0x1cb   : > { %s426_s9 = sadd.f32 %s425_s25, %s423_s26  ;;  %s420_s22 = smul.f32 %s591_s6, %s1194_s23 }
 0x1cd   : > { %s427_s8 = smax.f32 %s911_s29, %s426_s9  ;;  %s421_s18 = sadd.f32 %s420_s22, %s419_s1 }
 0x1ce   : > { %v429_v20 = vstv %s427_s8 }
 0x1cf   : > { %699 = vrcp.f32 %v429_v20  ;;  %s428_s10 = smul.f32 2.0, %s421_s18 }
 0x1d9   : > { %v700_v21 = vpop.eup %699 }
 0x1da   : > { %592 = vpush %v700_v21 }
 0x20b   : > { %s593_s0 = spop %592 }
 0x20c   : > { %s432_s2 = smul.f32 %s593_s0, %s428_s10 }
 0x20e   : > { %s433_s19 = ssub.f32 1.0, %s432_s2 }
 0x210   : > { %v434_v22 = vstv %s433_s19 }
 0x211   : > { %435 = vst.msk [vmem:[#allocation11] sm:$0x1] %vm332_vm2, %v434_v22 }
 0x212 PF: > { %p615_p6 = scmp.eq.s32.totalorder %s977_s21, 3  ;;  %s912_s4 = smov [#allocation11]  }
 0x213   : > { %s443_s29 = sshll.u32 %s912_s4, 4  ;;  %s444_s29 = int_to_ptr.vmem [resolvable:$true] %s443_s29 }
 0x214   : > { %s792_s24 = scalar_lea.vmem %s444_s29, 16  ;;  %s798_s23 = scalar_lea.vmem %s444_s29, 32 }
 0x215   : > { %p793_p2 = scmp.ne.s32.totalorder %s444_s29, %s792_s24  ;;  %p799_p12 = scmp.lt.s32.totalorder %s444_s29, %s444_s29 }
 0x216   : > { %p800_p13 = scmp.lt.s32.totalorder %s798_s23, %s792_s24 }
 0x217   : > { %p794_p8 = pnand %p793_p2, %p615_p6 }
 0x218   : > { %p801_p1 = por %p800_p13, %p799_p12 }
 0x219   : > { %p795_p11 = pneg %p794_p8 }
 0x21b   : > { %p802_p5 = pnand %p801_p1, %p795_p11 }
 0x21d   : > { %805 = shalt.err (!%p802_p5)
}
 0x21e   : > { %s806_s19 = scalar_lea.hbm %s1254_s3, 16 }
 0x21f   : > { %p807_p10 = scmp.ne.s32.totalorder %s1254_s3, %s806_s19  ;;  %p812_p9 = scmp.lt.u32.totalorder %s806_s19, %s1254_s3 }
 0x221   : > { %p808_p0 = pnand %p807_p10, %p615_p6 }
 0x223   : > { %p809_p7 = pneg %p808_p0 }
 0x225   : > { %p814_p3 = pnand %p812_p9, %p809_p7 }
 0x227   : > { %817 = shalt.err (!%p814_p3)
}
 0x228   : > { %601 = dma.vmem_to_hbm [thread:$0]  (%p615_p6), %s444_s29, 16, %s1254_s3, [#allocation7]  }
 0x229   : > { %867 = dma.done.wait (%p615_p6), [#allocation7], 16  }
 0x22a   : > { %869 = vsyncadd (%p615_p6), [#allocation7], 4294967280 }
 0x22b PF: > { %s20_s20 = sadd.s32 1, %s904_s20   ;;  %s1285_s18 = sld [smem:[#allocation16_spill]] }
 0x22c   : > { %p17_p4 = scmp.ge.s32.totalorder %s20_s20, 6   ;;  %s1286_s19 = sld [smem:[#allocation17_spill]] }
 0x22d   : > { %s1287_s12 = smov %s876_s13  ;;  %s1288_s13 = smov %s880_s14 }
 0x22e   : > { %s1289_s14 = smov %s1003_s30  ;;  %s1290_s15 = smov %s888_s16 }
 0x22f   : > { %s1291_s16 = smov %s892_s17  ;;  %s1292_s17 = smov %s1074_s7 }
 0x230   :  { %19 = sbr.rel (!%p17_p4) target bundleno = 13 (0xd), region = 101 }
 0x237   :  { %456 = vsyncpa [#allocation6], 1 }
 0x238   :  { %458 = vsyncpa [#allocation6 + $0x1], 1 }
 0x239   :  { %459 = vsyncpa [#allocation9], 1 }
 0x23a   :  { %461 = vsyncpa [#allocation9 + $0x1], 1 }
 0x23b   :  { %462 = vsyncpa [#allocation7], 1 }
 0x23c   :  { %464 = vsyncpa [#allocation7 + $0x1], 1 }

</bundles_post_ra>
